<compile_context>
chip_gen: v6e
topology: v6e:2x2x1
jax: 0.10.0
libtpu: 0.0.40
codegen_flags: <defaults>
</compile_context>

<pallas_src>
import functools

import jax
import jax.numpy as jnp
from jax.experimental import pallas as pl
from jax.experimental.pallas import tpu as pltpu

LN_EPS = 1e-5  # matches torch.nn.LayerNorm default


def _round_up(x, m):
    return ((x + m - 1) // m) * m


def _make_fused_kernel(n_layers):
    """Kernel: (x_ref, w0, b0, w1, b1, ..., o_ref). All layers in-VMEM."""

    def kernel(x_ref, *refs):
        o_ref = refs[-1]
        param_refs = refs[:-1]
        h = x_ref[...].astype(jnp.float32)
        for l in range(n_layers):
            w_ref = param_refs[2 * l]
            b_ref = param_refs[2 * l + 1]
            # LayerNorm core (affine already folded into w/b).
            mean = jnp.mean(h, axis=-1, keepdims=True)
            xc = h - mean
            var = jnp.mean(xc * xc, axis=-1, keepdims=True)
            z = xc * jax.lax.rsqrt(var + LN_EPS)
            # Linear on the MXU, f32 accumulation.
            h = jnp.dot(z, w_ref[...],
                        preferred_element_type=jnp.float32) + b_ref[...]
        o_ref[...] = h.astype(o_ref.dtype)

    return kernel


def init_mlp_decoder_params(key, config=(32,), n_classes=10):
    """Deterministic parameter init matching the torch module's shapes."""
    if not isinstance(config, (list, tuple)):
        config = [config]
    config = list(config)
    dims = [(config[i], config[i + 1]) for i in range(len(config) - 1)]
    dims.append((config[-1], n_classes))

    params = []
    for (d_in, d_out) in dims:
        key, k_w, k_b = jax.random.split(key, 3)
        gamma = jnp.ones((d_in,), jnp.float32)
        beta = jnp.zeros((d_in,), jnp.float32)
        bound = 1.0 / (d_in ** 0.5)  # torch.nn.Linear default init
        w = jax.random.uniform(k_w, (d_in, d_out), jnp.float32, -bound, bound)
        b = jax.random.uniform(k_b, (d_out,), jnp.float32, -bound, bound)
        params.append({"gamma": gamma, "beta": beta, "w": w, "b": b})
    return params


@functools.partial(jax.jit, static_argnames=("tm", "out_lane_pad"))
def mlp_decoder_forward(x, params, *, tm=512, out_lane_pad=128):
    """x: (..., config[0]) -> (..., n_classes). Single fused Pallas call."""
    lead = x.shape[:-1]
    x2d = x.reshape(-1, x.shape[-1])
    M, D0 = x2d.shape
    n_layers = len(params)
    n_classes = params[-1]["w"].shape[1]

    # --- fold LN affine into linear; lane-pad the final (class) dimension ---
    folded = []
    for li, layer in enumerate(params):
        gamma, beta, w, b = layer["gamma"], layer["beta"], layer["w"], layer["b"]
        w_f = gamma[:, None] * w          # (z*gamma+beta) @ W == z @ (gamma*W) + beta@W
        b_f = beta @ w + b
        if li == n_layers - 1:
            d_out = w.shape[1]
            d_pad = _round_up(max(d_out, out_lane_pad), out_lane_pad)
            w_f = jnp.pad(w_f, ((0, 0), (0, d_pad - d_out)))   # zero cols -> safe slice
            b_f = jnp.pad(b_f, ((0, d_pad - d_out),))
        folded.append((w_f, b_f.reshape(1, -1)))
    d_out_pad = folded[-1][0].shape[1]

    # --- row tiling: big tile, pad rows to a multiple of it (no divisibility assert) ---
    tm_eff = min(tm, _round_up(max(M, 1), 8))
    m_pad = _round_up(M, tm_eff)
    if m_pad != M:
        x2d = jnp.pad(x2d, ((0, m_pad - M), (0, 0)))
    grid = (m_pad // tm_eff,)

    # --- specs ---
    in_specs = [pl.BlockSpec((tm_eff, D0), lambda i: (i, 0))]
    flat_params = []
    for (w_f, b_f) in folded:
        in_specs.append(pl.BlockSpec(w_f.shape, lambda i: (0, 0)))   # resident weights
        in_specs.append(pl.BlockSpec(b_f.shape, lambda i: (0, 0)))
        flat_params.extend([w_f, b_f])
    out_spec = pl.BlockSpec((tm_eff, d_out_pad), lambda i: (i, 0))

    # --- advisory cost estimate ---
    dims = [D0] + [w.shape[1] for (w, _) in folded]
    flops = sum(2 * m_pad * a * b for a, b in zip(dims[:-1], dims[1:]))
    weight_bytes = sum(w.size * 4 + b.size * 4 for (w, b) in folded)
    bytes_accessed = m_pad * D0 * 4 + m_pad * d_out_pad * 4 + weight_bytes
    cost = pl.CostEstimate(flops=flops, transcendentals=m_pad * n_layers,
                           bytes_accessed=bytes_accessed)

    # --- explicit VMEM budget (v7x has 64 MiB/TC; leave double-buffer headroom) ---
    max_dim = max(dims)
    vmem_bytes = (2 * tm_eff * D0 * 4            # input double buffer
                  + 2 * tm_eff * d_out_pad * 4   # output double buffer
                  + 2 * weight_bytes             # resident params
                  + 4 * tm_eff * max_dim * 4)    # intermediate activations slack
    vmem_limit = int(min(max(2 * vmem_bytes, 4 << 20), 64 << 20))

    kernel = _make_fused_kernel(n_layers)
    out = pl.pallas_call(
        kernel,
        out_shape=jax.ShapeDtypeStruct((m_pad, d_out_pad), x.dtype),
        grid_spec=pltpu.PrefetchScalarGridSpec(
            num_scalar_prefetch=0,
            grid=grid,
            in_specs=in_specs,
            out_specs=out_spec,
        ),
        compiler_params=pltpu.CompilerParams(
            dimension_semantics=("parallel",),
            vmem_limit_bytes=vmem_limit),
        cost_estimate=cost,
    )(x2d, *flat_params)

    out = out[:M, :n_classes]
    return out.reshape(*lead, n_classes)


def _reference_forward(x, params):
    h = x.astype(jnp.float32)
    for layer in params:
        mean = jnp.mean(h, axis=-1, keepdims=True)
        var = jnp.mean((h - mean) ** 2, axis=-1, keepdims=True)
        h = (h - mean) / jnp.sqrt(var + LN_EPS)
        h = h * layer["gamma"] + layer["beta"]
        h = h @ layer["w"] + layer["b"]
    return h


if __name__ == "__main__":
    key = jax.random.PRNGKey(0)
    k_x, k_p = jax.random.split(key)

    # Small shapes: batch=2, seq=8, features follow config=(32, 64), n_classes=10.
    config = (32, 64)
    n_classes = 10
    x = jax.random.normal(k_x, (2, 8, config[0]), jnp.float32)

    params = init_mlp_decoder_params(k_p, config=config, n_classes=n_classes)

    out = mlp_decoder_forward(x, params)
    out = jax.block_until_ready(out)

    ref = _reference_forward(x, params)
    assert out.shape == (2, 8, n_classes), out.shape
    assert jnp.allclose(out, ref, atol=1e-4, rtol=1e-4), (
        float(jnp.max(jnp.abs(out - ref))))

    print("KERNEL_OK")
</pallas_src>

<mosaic_0001>
module attributes {stable_mosaic.version = 11 : i64} {
  func.func @kernel(%arg0: i32, %arg1: memref<16x32xf32, #tpu.memory_space<vmem>>, %arg2: memref<32x64xf32, #tpu.memory_space<vmem>>, %arg3: memref<1x64xf32, #tpu.memory_space<vmem>>, %arg4: memref<64x128xf32, #tpu.memory_space<vmem>>, %arg5: memref<1x128xf32, #tpu.memory_space<vmem>>, %arg6: memref<16x128xf32, #tpu.memory_space<vmem>>) attributes {dimension_semantics = [#tpu.dimension_semantics<parallel>], iteration_bounds = array<i64: 1>, scalar_prefetch = 0 : i64, scratch_operands = 0 : i64, tpu.core_type = #tpu.core_type<tc>, window_params = [{transform_indices = @transform_0, window_bounds = array<i64: 16, 32>}, {pipeline_mode = #tpu.pipeline_mode<synchronous>, transform_indices = @transform_1, window_bounds = array<i64: 32, 64>}, {pipeline_mode = #tpu.pipeline_mode<synchronous>, transform_indices = @transform_2, window_bounds = array<i64: 1, 64>}, {pipeline_mode = #tpu.pipeline_mode<synchronous>, transform_indices = @transform_3, window_bounds = array<i64: 64, 128>}, {pipeline_mode = #tpu.pipeline_mode<synchronous>, transform_indices = @transform_4, window_bounds = array<i64: 1, 128>}, {transform_indices = @transform_5, window_bounds = array<i64: 16, 128>}]} {
    %c0 = arith.constant 0 : index
    %c0_0 = arith.constant 0 : index
    %0 = vector.load %arg1[%c0, %c0_0] : memref<16x32xf32, #tpu.memory_space<vmem>>, vector<16x32xf32>
    %cst = arith.constant dense<0.000000e+00> : vector<16xf32>
    %1 = vector.multi_reduction <add>, %0, %cst [1] : vector<16x32xf32> to vector<16xf32>
    %2 = vector.shape_cast %1 : vector<16xf32> to vector<16x1xf32>
    %cst_1 = arith.constant 3.200000e+01 : f32
    %3 = vector.broadcast %cst_1 : f32 to vector<16x1xf32>
    %4 = arith.divf %2, %3 : vector<16x1xf32>
    %5 = vector.broadcast %4 : vector<16x1xf32> to vector<16x32xf32>
    %6 = arith.subf %0, %5 : vector<16x32xf32>
    %7 = arith.mulf %6, %6 : vector<16x32xf32>
    %cst_2 = arith.constant dense<0.000000e+00> : vector<16xf32>
    %8 = vector.multi_reduction <add>, %7, %cst_2 [1] : vector<16x32xf32> to vector<16xf32>
    %9 = vector.shape_cast %8 : vector<16xf32> to vector<16x1xf32>
    %cst_3 = arith.constant 3.200000e+01 : f32
    %10 = vector.broadcast %cst_3 : f32 to vector<16x1xf32>
    %11 = arith.divf %9, %10 : vector<16x1xf32>
    %cst_4 = arith.constant 9.99999974E-6 : f32
    %12 = vector.broadcast %cst_4 : f32 to vector<16x1xf32>
    %13 = arith.addf %11, %12 : vector<16x1xf32>
    %14 = math.rsqrt %13 : vector<16x1xf32>
    %15 = vector.broadcast %14 : vector<16x1xf32> to vector<16x32xf32>
    %16 = arith.mulf %6, %15 : vector<16x32xf32>
    %c0_5 = arith.constant 0 : index
    %c0_6 = arith.constant 0 : index
    %17 = vector.load %arg2[%c0_5, %c0_6] : memref<32x64xf32, #tpu.memory_space<vmem>>, vector<32x64xf32>
    %cst_7 = arith.constant dense<0.000000e+00> : vector<16x64xf32>
    %18 = tpu.matmul %16, %17, %cst_7 {dimension_numbers = #tpu.dot_dimension_numbers<[1], [0], [0], [1], [0, 0, 1, 1], [], []>} : vector<16x32xf32>, vector<32x64xf32>, vector<16x64xf32> -> vector<16x64xf32>
    %c0_8 = arith.constant 0 : index
    %c0_9 = arith.constant 0 : index
    %19 = vector.load %arg3[%c0_8, %c0_9] : memref<1x64xf32, #tpu.memory_space<vmem>>, vector<1x64xf32>
    %20 = vector.broadcast %19 : vector<1x64xf32> to vector<16x64xf32>
    %21 = arith.addf %18, %20 : vector<16x64xf32>
    %cst_10 = arith.constant dense<0.000000e+00> : vector<16xf32>
    %22 = vector.multi_reduction <add>, %21, %cst_10 [1] : vector<16x64xf32> to vector<16xf32>
    %23 = vector.shape_cast %22 : vector<16xf32> to vector<16x1xf32>
    %cst_11 = arith.constant 6.400000e+01 : f32
    %24 = vector.broadcast %cst_11 : f32 to vector<16x1xf32>
    %25 = arith.divf %23, %24 : vector<16x1xf32>
    %26 = vector.broadcast %25 : vector<16x1xf32> to vector<16x64xf32>
    %27 = arith.subf %21, %26 : vector<16x64xf32>
    %28 = arith.mulf %27, %27 : vector<16x64xf32>
    %cst_12 = arith.constant dense<0.000000e+00> : vector<16xf32>
    %29 = vector.multi_reduction <add>, %28, %cst_12 [1] : vector<16x64xf32> to vector<16xf32>
    %30 = vector.shape_cast %29 : vector<16xf32> to vector<16x1xf32>
    %cst_13 = arith.constant 6.400000e+01 : f32
    %31 = vector.broadcast %cst_13 : f32 to vector<16x1xf32>
    %32 = arith.divf %30, %31 : vector<16x1xf32>
    %cst_14 = arith.constant 9.99999974E-6 : f32
    %33 = vector.broadcast %cst_14 : f32 to vector<16x1xf32>
    %34 = arith.addf %32, %33 : vector<16x1xf32>
    %35 = math.rsqrt %34 : vector<16x1xf32>
    %36 = vector.broadcast %35 : vector<16x1xf32> to vector<16x64xf32>
    %37 = arith.mulf %27, %36 : vector<16x64xf32>
    %c0_15 = arith.constant 0 : index
    %c0_16 = arith.constant 0 : index
    %38 = vector.load %arg4[%c0_15, %c0_16] : memref<64x128xf32, #tpu.memory_space<vmem>>, vector<64x128xf32>
    %cst_17 = arith.constant dense<0.000000e+00> : vector<16x128xf32>
    %39 = tpu.matmul %37, %38, %cst_17 {dimension_numbers = #tpu.dot_dimension_numbers<[1], [0], [0], [1], [0, 0, 1, 1], [], []>} : vector<16x64xf32>, vector<64x128xf32>, vector<16x128xf32> -> vector<16x128xf32>
    %c0_18 = arith.constant 0 : index
    %c0_19 = arith.constant 0 : index
    %40 = vector.load %arg5[%c0_18, %c0_19] : memref<1x128xf32, #tpu.memory_space<vmem>>, vector<1x128xf32>
    %41 = vector.broadcast %40 : vector<1x128xf32> to vector<16x128xf32>
    %42 = arith.addf %39, %41 : vector<16x128xf32>
    %c0_20 = arith.constant 0 : index
    %c0_21 = arith.constant 0 : index
    %43 = vector.load %arg6[%c0_20, %c0_21] : memref<16x128xf32, #tpu.memory_space<vmem>>, vector<16x128xf32>
    tpu.vector_store %arg6[%c0_20, %c0_21], %42 {strides = array<i32>} : memref<16x128xf32, #tpu.memory_space<vmem>>, vector<16x128xf32>,
    return
  }
  func.func @transform_0(%arg0: i32) -> (i32, i32) {
    %c0_i32 = arith.constant 0 : i32
    %c0_i32_0 = arith.constant 0 : i32
    return %arg0, %c0_i32 : i32, i32
  }
  func.func @transform_1(%arg0: i32) -> (i32, i32) {
    %c0_i32 = arith.constant 0 : i32
    %c0_i32_0 = arith.constant 0 : i32
    %c0_i32_1 = arith.constant 0 : i32
    return %c0_i32, %c0_i32_0 : i32, i32
  }
  func.func @transform_2(%arg0: i32) -> (i32, i32) {
    %c0_i32 = arith.constant 0 : i32
    %c0_i32_0 = arith.constant 0 : i32
    %c0_i32_1 = arith.constant 0 : i32
    return %c0_i32, %c0_i32_0 : i32, i32
  }
  func.func @transform_3(%arg0: i32) -> (i32, i32) {
    %c0_i32 = arith.constant 0 : i32
    %c0_i32_0 = arith.constant 0 : i32
    %c0_i32_1 = arith.constant 0 : i32
    return %c0_i32, %c0_i32_0 : i32, i32
  }
  func.func @transform_4(%arg0: i32) -> (i32, i32) {
    %c0_i32 = arith.constant 0 : i32
    %c0_i32_0 = arith.constant 0 : i32
    %c0_i32_1 = arith.constant 0 : i32
    return %c0_i32, %c0_i32_0 : i32, i32
  }
  func.func @transform_5(%arg0: i32) -> (i32, i32) {
    %c0_i32 = arith.constant 0 : i32
    %c0_i32_0 = arith.constant 0 : i32
    return %arg0, %c0_i32 : i32, i32
  }
}

</mosaic_0001>

<bundles_post_ra>
// kernel: mlp_decoder_forward.1
= control target key start
LH: loop header
LB: loop body
LE: loop exit
PB: predicated region body
PF: predicated region fallthrough
CT: control target
= control target key end

     0   :  { %vm22_vm0 = vcmask 261120   ;;  %vm142_vm1 = vcmask 523264   ;;  %s428_s0 = inlined_call_operand.vmem [shape: f32[16,32], index: 0, kind: input, shape index: {}]   ;;  %s429_s1 = inlined_call_operand.vmem [shape: f32[32,64], index: 1, kind: input, shape index: {}]   ;;  %s430_s2 = inlined_call_operand.vmem [shape: f32[1,64], index: 2, kind: input, shape index: {}]   ;;  %s431_s3 = inlined_call_operand.vmem [shape: f32[64,128], index: 3, kind: input, shape index: {}]   ;;  %s432_s4 = inlined_call_operand.vmem [shape: f32[1,128], index: 4, kind: input, shape index: {}]   ;;  %s433_s5 = inlined_call_operand.vmem [shape: f32[16,128], index: 5, kind: output, shape index: {}]  }
   0x1   :  { %v20_v0 = vld [vmem:[%s428_s0] sm:$0xff]  ;;  %v21_v1 = vld [vmem:[%s428_s0 + $0x8] sm:$0xff]  ;;  %v53_v14 = vld [vmem:[%s429_s1 + $0x18] sm:$0xff] }
   0x2   :  { %v23_v2 = vsel %vm22_vm0, %v20_v0, 0.0  ;;  %v26_v3 = vsel %vm22_vm0, %v21_v1, 0.0  ;;  %v52_v15 = vld [vmem:[%s429_s1 + $0x10] sm:$0xff]  ;;  %294 = vmatprep.subr.mxu0 %v53_v14  ;;  %v51_v16 = vld [vmem:[%s429_s1 + $0x8] sm:$0xff]  ;;  %v50_v17 = vld [vmem:[%s429_s1] sm:$0xff] }
   0x3   :  { %24 = vadd.xlane.f32.xlu0 %v23_v2  ;;  %295 = vmatpush3.msra.mxu0 %v53_v14  ;;  %v272_v28 = vld [vmem:[%s430_s2] ss:$0 sm:$0xff]  ;;  %v177_v45 = vld [vmem:[%s431_s3 + $0x38] sm:$0xff]  ;;  %v176_v46 = vld [vmem:[%s431_s3 + $0x30] sm:$0xff] }
   0x4   :  { %296 = vmatprep.subr.mxu0 %v52_v15  ;;  %305 = vmatprep.subr.mxu1 %v177_v45  ;;  %v175_v47 = vld [vmem:[%s431_s3 + $0x28] sm:$0xff]  ;;  %v174_v48 = vld [vmem:[%s431_s3 + $0x20] sm:$0xff]  ;;  %v173_v49 = vld [vmem:[%s431_s3 + $0x18] sm:$0xff] }
   0x5   :  { %297 = vmatpush3.msra.mxu0 %v52_v15  ;;  %306 = vmatpush3.msra.mxu1 %v177_v45  ;;  %v172_v50 = vld [vmem:[%s431_s3 + $0x10] sm:$0xff]  ;;  %v171_v51 = vld [vmem:[%s431_s3 + $0x8] sm:$0xff]  ;;  %v170_v52 = vld [vmem:[%s431_s3] sm:$0xff] }
   0x6   :  { %298 = vmatprep.subr.mxu0 %v51_v16  ;;  %307 = vmatprep.subr.mxu1 %v176_v46  ;;  %v275_v63 = vld [vmem:[%s432_s4] ss:$0 sm:$0xff] }
   0x7   :  { %27 = vadd.xlane.f32.xlu0 %v26_v3  ;;  %299 = vmatpush3.msra.mxu0 %v51_v16 }
   0x8   :  { %300 = vmatprep.subr.mxu0 %v50_v17  ;;  %308 = vmatpush3.msra.mxu1 %v176_v46 }
   0x9   :  { %301 = vmatpush3.msra.mxu0 %v50_v17  ;;  %309 = vmatprep.subr.mxu1 %v175_v47 }
   0xa   :  { %310 = vmatpush3.msra.mxu1 %v175_v47 }
   0xb   :  { %311 = vmatprep.subr.mxu1 %v174_v48 }
   0xc   :  { %312 = vmatpush3.msra.mxu1 %v174_v48 }
   0xd   :  { %313 = vmatprep.subr.mxu1 %v173_v49 }
   0xe   :  { %314 = vmatpush3.msra.mxu1 %v173_v49 }
   0xf   :  { %315 = vmatprep.subr.mxu1 %v172_v50 }
  0x10   :  { %316 = vmatpush3.msra.mxu1 %v172_v50 }
  0x11   :  { %317 = vmatprep.subr.mxu1 %v171_v51 }
  0x12   :  { %318 = vmatpush3.msra.mxu1 %v171_v51 }
  0x13   :  { %319 = vmatprep.subr.mxu1 %v170_v52 }
  0x14   :  { %320 = vmatpush3.msra.mxu1 %v170_v52 }
  0x8c   :  { %v25_v4 = vpop.xlane.xlu0 %24 }
  0x8d   :  { %v30_v5 = vmul.f32 0.03125, %v25_v4 }
  0x8f   :  { %v32_v6 = vsub.f32 %v20_v0, %v30_v5 }
  0x90   :  { %v28_v7 = vpop.xlane.xlu0 %27 }
  0x91   :  { %v31_v8 = vmul.f32 0.03125, %v28_v7  ;;  %v34_v9 = vmul.f32 %v32_v6, %v32_v6 }
  0x93   :  { %v33_v10 = vsub.f32 %v21_v1, %v31_v8  ;;  %v36_v11 = vsel %vm22_vm0, %v34_v9, 0.0 }
  0x94   :  { %37 = vadd.xlane.f32.xlu1 %v36_v11 }
  0x95   :  { %v35_v12 = vmul.f32 %v33_v10, %v33_v10 }
  0x97   :  { %v39_v13 = vsel %vm22_vm0, %v35_v12, 0.0 }
  0x98   :  { %40 = vadd.xlane.f32.xlu1 %v39_v13 }
 0x11d   :  { %v38_v18 = vpop.xlane.xlu1 %37 }
 0x11e   :  { %v42_v19 = vmul.f32 0.03125, %v38_v18 }
 0x120   :  { %v44_v20 = vadd.f32 1e-05, %v42_v19 }
 0x121   :  { %v41_v21 = vpop.xlane.xlu1 %40 }
 0x122   :  { %324 = vrsqrt.f32 %v44_v20  ;;  %v43_v22 = vmul.f32 0.03125, %v41_v21 }
 0x124   :  { %v45_v23 = vadd.f32 1e-05, %v43_v22 }
 0x126   :  { %326 = vrsqrt.f32 %v45_v23 }
 0x12f   :  { %v325_v24 = vpop.eup %324 }
 0x130   :  { %v48_v25 = vmul.f32 %v325_v24, %v32_v6 }
 0x132   :  { %302 = vmatprep.mubr.msk.f32.mxu0 %vm22_vm0, %v48_v25 }
 0x133   :  { %v327_v26 = vpop.eup %326 }
 0x134   :  { %v49_v27 = vmul.f32 %v327_v26, %v33_v10 }
 0x136   :  { %303 = vmatmul.mubr.msk.f32.vlgmr.msra.gmra.mxu0 %vm22_vm0, %v49_v27 }
 0x1f6   :  { %v304_v29 = vpop.f32.mrf.mxu0 }
 0x1f7   :  { %v139_v30 = vadd.f32 %v304_v29, %v272_v28 }
 0x1f8   :  { %v133_v31 = vpop.f32.mrf.mxu0 }
 0x1f9   :  { %v134_v32 = vadd.f32 %v272_v28, %v133_v31  ;;  %v146_v33 = vsel %vm142_vm1, %v139_v30, 0.0 }
 0x1fa   :  { %147 = vadd.xlane.f32.xlu1 %v146_v33 }
 0x1fb   :  { %v143_v34 = vsel %vm142_vm1, %v134_v32, 0.0 }
 0x1fc   :  { %144 = vadd.xlane.f32.xlu0 %v143_v34 }
 0x283   :  { %v148_v35 = vpop.xlane.xlu1 %147 }
 0x284   :  { %v151_v36 = vmul.f32 0.015625, %v148_v35 }
 0x285   :  { %v145_v37 = vpop.xlane.xlu0 %144 }
 0x286   :  { %v153_v38 = vsub.f32 %v139_v30, %v151_v36  ;;  %v150_v39 = vmul.f32 0.015625, %v145_v37 }
 0x288   :  { %v152_v40 = vsub.f32 %v134_v32, %v150_v39  ;;  %v155_v41 = vmul.f32 %v153_v38, %v153_v38 }
 0x28a   :  { %v159_v42 = vsel %vm142_vm1, %v155_v41, 0.0  ;;  %v154_v43 = vmul.f32 %v152_v40, %v152_v40 }
 0x28b   :  { %160 = vadd.xlane.f32.xlu1 %v159_v42 }
 0x28c   :  { %v156_v44 = vsel %vm142_vm1, %v154_v43, 0.0 }
 0x28d   :  { %157 = vadd.xlane.f32.xlu0 %v156_v44 }
 0x314   :  { %v161_v53 = vpop.xlane.xlu1 %160 }
 0x315   :  { %v163_v54 = vmul.f32 0.015625, %v161_v53 }
 0x316   :  { %v158_v55 = vpop.xlane.xlu0 %157 }
 0x317   :  { %v165_v56 = vadd.f32 1e-05, %v163_v54  ;;  %v162_v57 = vmul.f32 0.015625, %v158_v55 }
 0x319   :  { %v164_v58 = vadd.f32 1e-05, %v162_v57  ;;  %328 = vrsqrt.f32 %v165_v56 }
 0x31b   :  { %330 = vrsqrt.f32 %v164_v58 }
 0x326   :  { %v329_v59 = vpop.eup %328 }
 0x327   :  { %v169_v62 = vmul.f32 %v329_v59, %v153_v38 }
 0x328   :  { %v331_v60 = vpop.eup %330 }
 0x329   :  { %v168_v61 = vmul.f32 %v331_v60, %v152_v40 }
 0x32b   :  { %321 = vmatprep.mubr.msk.f32.mxu1 %vm142_vm1, %v168_v61 }
 0x32c   :  { %322 = vmatmul.mubr.msk.f32.vlgmr.msra.gmra.mxu1 %vm142_vm1, %v169_v62 }
 0x3ec   :  { %v323_v0 = vpop.f32.mrf.mxu1 }
 0x3ed   :  { %v263_v1 = vadd.f32 %v323_v0, %v275_v63 }
 0x3ee   :  { %v257_v2 = vpop.f32.mrf.mxu1 }
 0x3ef   :  { %267 = vst [vmem:[%s433_s5 + $0x8] sm:$0xff] %v263_v1  ;;  %v258_v3 = vadd.f32 %v275_v63, %v257_v2 }
 0x3f1   :  { %266 = vst [vmem:[%s433_s5] sm:$0xff] %v258_v3 }

</bundles_post_ra>
